<compile_context>
chip_gen: v6e
topology: v6e:2x2x1
jax: 0.10.0
libtpu: 0.0.40
codegen_flags: <defaults>
</compile_context>

<pallas_src>
import functools

import jax
import jax.numpy as jnp
from jax.experimental import pallas as pl
from jax.experimental.pallas import tpu as pltpu


def _mma_kernel(Whk_ref, Wg_ref, vec_ref, h_ref, hf_ref, ht_ref, out_ref, *,
                inv_attention=False):
    f32 = jnp.float32
    cdt = Whk_ref.dtype                      # MXU compute dtype (bf16 by default)

    H = h_ref.shape[-1]
    Nv = hf_ref.shape[1]
    Nt = ht_ref.shape[1]

    h = h_ref[0]                             # (1, H)   f32
    hf = hf_ref[0]                           # (Nv, H)  f32
    htx = ht_ref[0]                          # (Nt, H)  f32

    # Lane-dense (1, H) bias / vector rows, hoisted ahead of the matmuls so the
    # vector-load slots overlap MXU latency.
    Vav = vec_ref[0:1, :]
    Vat = vec_ref[1:2, :]
    wb = vec_ref[2:3, :]
    bav = vec_ref[3:4, :]
    bat = vec_ref[4:5, :]
    bh = vec_ref[5:6, :]
    bvse = vec_ref[6:7, :]
    bqse = vec_ref[7:8, :]
    bbv = vec_ref[8:9, :]
    bbt = vec_ref[9:10, :]

    # --- All h-only projections in one (1,H)@(H,4H) matmul: [Whh | Wb | Uav | Uat].
    h_proj = jnp.dot(h.astype(cdt), Whk_ref[:, 2 * H:6 * H],
                     preferred_element_type=f32)              # (1, 4H)
    Whh_h = h_proj[:, 0:H]                   # h @ Whh
    Wbs = h_proj[:, H:2 * H]                 # h @ Wb
    Uav_h = h_proj[:, 2 * H:3 * H]           # h @ Uav
    Uat_h = h_proj[:, 3 * H:4 * H]           # h @ Uat

    # --- Both attention branches in one MXU launch:
    #       [hf ; htx] (Nv+Nt, H) @ [Wav | Wat] (H, 2H)
    xcat = jnp.concatenate([hf, htx], axis=0)                 # (Nv+Nt, H) f32
    S = jnp.dot(xcat.astype(cdt), Whk_ref[:, 0:2 * H],
                preferred_element_type=f32)                   # (Nv+Nt, 2H)
    tv = jnp.tanh(S[0:Nv, 0:H] + Uav_h + bav)                 # (Nv, H)
    tt = jnp.tanh(S[Nv:Nv + Nt, H:2 * H] + Uat_h + bat)       # (Nt, H)

    # Score projection: VPU multiply + lane reduction (no N=1 MXU launches).
    att_v = jnp.sum(tv * Vav, axis=-1, keepdims=True)         # (Nv, 1)
    att_t = jnp.sum(tt * Vat, axis=-1, keepdims=True)         # (Nt, 1)
    if inv_attention:
        att_v = -att_v
        att_t = -att_t

    def softmax_rows(x):              # softmax over the sequence (sublane) axis
        m = jnp.max(x, axis=0, keepdims=True)
        e = jnp.exp(x - m)
        return e * pl.reciprocal(jnp.sum(e, axis=0, keepdims=True), approx=True)

    att_v = softmax_rows(att_v)                               # (Nv, 1)
    att_t = softmax_rows(att_t)                               # (Nt, 1)

    # Attention-weighted sums (VPU broadcast multiply + sublane reduce), in f32.
    hv_sum = jnp.sum(att_v * hf, axis=0, keepdims=True)       # (1, H)
    ht_sum = jnp.sum(att_t * htx, axis=0, keepdims=True)      # (1, H)

    # --- Encoder + fusion-gate projections in one MXU launch:
    #     [hv_sum | ht_sum] (1, 2H) @ block-diag([Wvse|Vbv], [Wqse|Vbt]) (2H, 4H)
    svec = jnp.concatenate([hv_sum, ht_sum], axis=1)          # (1, 2H)
    gate = jnp.dot(svec.astype(cdt), Wg_ref[...],
                   preferred_element_type=f32)                # (1, 4H)
    hv_sum2 = gate[:, 0:H] + bvse            # video_sum_encoder(hv_sum)
    mv1 = gate[:, H:2 * H] + bbv + Wbs       # hv_sum @ Vbv + bbv + h @ Wb
    ht_sum2 = gate[:, 2 * H:3 * H] + bqse    # question_sum_encoder(ht_sum)
    mt1 = gate[:, 3 * H:4 * H] + bbt + Wbs   # ht_sum @ Vbt + bbt + h @ Wb

    # Modality fusion gate: for one sample the concat + axis-0 softmax of
    # [mv1; mt1] reduces exactly to a 2-way softmax over two scalars.
    sv = jnp.sum(jnp.tanh(mv1) * wb, axis=-1, keepdims=True)  # (1, 1)
    st = jnp.sum(jnp.tanh(mt1) * wb, axis=-1, keepdims=True)  # (1, 1)
    beta0 = pl.reciprocal(1.0 + jnp.exp(st - sv), approx=True)  # sigmoid(sv - st)
    beta1 = 1.0 - beta0

    out = jnp.tanh(Whh_h + beta0 * hv_sum2 + beta1 * ht_sum2 + bh)  # (1, H)
    out_ref[...] = out.reshape(1, 1, H).astype(out_ref.dtype)


def pack_params(p, weight_dtype=jnp.bfloat16):
    """One-time packing of module parameters into fused, lane-dense slabs."""
    H = p["Wav"].shape[0]
    f32 = jnp.float32
    z = jnp.zeros((H, H), f32)
    # (H, 6H): [Wav | Wat | Whh | Wb | Uav | Uat]
    W_hk = jnp.concatenate(
        [p["Wav"], p["Wat"], p["Whh"], p["Wb"], p["Uav"], p["Uat"]], axis=1)
    # (2H, 4H) block-diagonal:  row-block 0 -> [Wvse | Vbv |  0   |  0  ]
    #                           row-block 1 -> [ 0   |  0  | Wqse | Vbt ]
    W_gate = jnp.concatenate([
        jnp.concatenate([p["Wvse"], p["Vbv"], z, z], axis=1),
        jnp.concatenate([z, z, p["Wqse"], p["Vbt"]], axis=1),
    ], axis=0)
    vecs = jnp.stack([                                        # (10, H) f32
        p["Vav"], p["Vat"], p["wb"],
        p["bav"].reshape(H), p["bat"].reshape(H), p["bh"].reshape(H),
        p["bvse"], p["bqse"], p["bbv"], p["bbt"],
    ], axis=0).astype(f32)
    return dict(W_hk=W_hk.astype(weight_dtype),
                W_gate=W_gate.astype(weight_dtype),
                vecs=vecs)


def multimodal_attention(h, hidden_frames, hidden_text, packed, inv_attention=False):
    """Batched forward: each row of `h` is an independent B=1 module invocation.

    h: (B, H), hidden_frames: (B, Nv, H), hidden_text: (B, Nt, H) -> (B, H).
    """
    B, H = h.shape
    Nv = hidden_frames.shape[1]
    Nt = hidden_text.shape[1]
    assert H % 128 == 0, "hidden_size must be a multiple of 128 (lane tile)"

    W_hk, W_gate, vecs = packed["W_hk"], packed["W_gate"], packed["vecs"]
    h3 = h.reshape(B, 1, H)   # metadata-only reshape -> tile-legal (1,1,H) blocks

    out = pl.pallas_call(
        functools.partial(_mma_kernel, inv_attention=inv_attention),
        out_shape=jax.ShapeDtypeStruct((B, 1, H), jnp.float32),
        grid_spec=pltpu.PrefetchScalarGridSpec(
            num_scalar_prefetch=0,
            grid=(B,),
            in_specs=[
                # Weights: constant block index -> DMA'd once, VMEM-resident
                # across all grid steps (no per-step re-fetch).
                pl.BlockSpec((H, 6 * H), lambda b: (0, 0)),
                pl.BlockSpec((2 * H, 4 * H), lambda b: (0, 0)),
                pl.BlockSpec((10, H), lambda b: (0, 0)),
                # Per-sample data blocks.
                pl.BlockSpec((1, 1, H), lambda b: (b, 0, 0)),
                pl.BlockSpec((1, Nv, H), lambda b: (b, 0, 0)),
                pl.BlockSpec((1, Nt, H), lambda b: (b, 0, 0)),
            ],
            out_specs=pl.BlockSpec((1, 1, H), lambda b: (b, 0, 0)),
        ),
        compiler_params=pltpu.CompilerParams(
            dimension_semantics=("parallel",)),   # v7x: split batch over 2 TCs
    )(W_hk, W_gate, vecs, h3, hidden_frames, hidden_text)
    return out.reshape(B, H)


def init_params(key, H):
    """Deterministic synthetic parameters (shapes match the PyTorch module)."""
    ks = jax.random.split(key, 20)

    def nrm(k, shape, std):
        return (std * jax.random.normal(k, shape)).astype(jnp.float32)

    return dict(
        Wav=nrm(ks[0], (H, H), 0.1),
        Wat=nrm(ks[1], (H, H), 0.1),
        Uav=nrm(ks[2], (H, H), 0.1),
        Uat=nrm(ks[3], (H, H), 0.1),
        Vav=nrm(ks[4], (H,), 0.1),
        Vat=nrm(ks[5], (H,), 0.1),
        bav=nrm(ks[6], (1, 1, H), 0.05),
        bat=nrm(ks[7], (1, 1, H), 0.05),
        Whh=nrm(ks[8], (H, H), 0.1),
        bh=nrm(ks[9], (1, 1, H), 0.05),
        Wvse=nrm(ks[10], (H, H), 0.1),     # nn.Linear weight used as (in, out)
        bvse=nrm(ks[11], (H,), 0.05),
        Wqse=nrm(ks[12], (H, H), 0.1),
        bqse=nrm(ks[13], (H,), 0.05),
        Wb=nrm(ks[14], (H, H), 0.01),
        Vbv=nrm(ks[15], (H, H), 0.01),
        Vbt=nrm(ks[16], (H, H), 0.01),
        bbv=nrm(ks[17], (H,), 0.05),
        bbt=nrm(ks[18], (H,), 0.05),
        wb=nrm(ks[19], (H,), 0.01),
    )


def reference_forward(h, hf, htx, p, inv_attention=False):
    """Pure-JAX mirror of the PyTorch forward for a single sample (B=1)."""
    Uhv = (h @ p["Uav"])[:, None, :]
    Uht = (h @ p["Uat"])[:, None, :]
    att_v = jnp.einsum("bnh,h->bn", jnp.tanh(hf @ p["Wav"] + Uhv + p["bav"]), p["Vav"])
    att_t = jnp.einsum("bnh,h->bn", jnp.tanh(htx @ p["Wat"] + Uht + p["bat"]), p["Vat"])
    if inv_attention:
        att_v, att_t = -att_v, -att_t
    att_v = jax.nn.softmax(att_v, axis=1)
    att_t = jax.nn.softmax(att_t, axis=1)
    hv_sum = jnp.sum(att_v[:, :, None] * hf, axis=1)
    ht_sum = jnp.sum(att_t[:, :, None] * htx, axis=1)
    hv_sum2 = hv_sum @ p["Wvse"] + p["bvse"]
    ht_sum2 = ht_sum @ p["Wqse"] + p["bqse"]
    Wbs = h @ p["Wb"]
    mt1 = ht_sum @ p["Vbt"] + p["bbt"] + Wbs
    mv1 = hv_sum @ p["Vbv"] + p["bbv"] + Wbs
    mtv2 = jnp.tanh(jnp.concatenate([mv1, mt1], axis=0)) @ p["wb"]
    beta = jax.nn.softmax(mtv2, axis=0)
    return jnp.tanh(h @ p["Whh"] + beta[0] * hv_sum2 + beta[1] * ht_sum2
                    + p["bh"].reshape(1, -1))


if __name__ == "__main__":
    # 4 independent (B=1) module invocations batched over the grid axis.
    B, Nv, Nt, H = 4, 16, 8, 128

    key = jax.random.PRNGKey(0)
    k_h, k_f, k_t, k_p = jax.random.split(key, 4)
    h = jax.random.normal(k_h, (B, H), jnp.float32)
    hidden_frames = jax.random.normal(k_f, (B, Nv, H), jnp.float32)
    hidden_text = jax.random.normal(k_t, (B, Nt, H), jnp.float32)
    params = init_params(k_p, H)
    packed = pack_params(params)          # bf16 weight slabs, f32 bias/vector slab

    out = multimodal_attention(h, hidden_frames, hidden_text, packed)
    out_inv = multimodal_attention(h, hidden_frames, hidden_text, packed,
                                   inv_attention=True)
    out, out_inv = jax.block_until_ready((out, out_inv))

    ref = jnp.concatenate([
        reference_forward(h[b:b + 1], hidden_frames[b:b + 1],
                          hidden_text[b:b + 1], params)
        for b in range(B)], axis=0)
    ref_inv = jnp.concatenate([
        reference_forward(h[b:b + 1], hidden_frames[b:b + 1],
                          hidden_text[b:b + 1], params, inv_attention=True)
        for b in range(B)], axis=0)

    assert out.shape == (B, H)
    # bf16 weight slabs + bf16 matmul-LHS casts -> relaxed tolerance vs f32 ref.
    assert jnp.allclose(out, ref, atol=3e-2, rtol=3e-2), "mismatch vs reference"
    assert jnp.allclose(out_inv, ref_inv, atol=3e-2, rtol=3e-2), \
        "mismatch vs reference (inv_attention)"

    print("KERNEL_OK")
</pallas_src>

<mosaic_0001>
module attributes {stable_mosaic.version = 11 : i64} {
  func.func @_mma_kernel(%arg0: i32, %arg1: memref<128x768xbf16, #tpu.memory_space<vmem>>, %arg2: memref<256x512xbf16, #tpu.memory_space<vmem>>, %arg3: memref<10x128xf32, #tpu.memory_space<vmem>>, %arg4: memref<1x1x128xf32, #tpu.memory_space<vmem>>, %arg5: memref<1x16x128xf32, #tpu.memory_space<vmem>>, %arg6: memref<1x8x128xf32, #tpu.memory_space<vmem>>, %arg7: memref<1x1x128xf32, #tpu.memory_space<vmem>>) attributes {dimension_semantics = [#tpu.dimension_semantics<parallel>], iteration_bounds = array<i64: 4>, scalar_prefetch = 0 : i64, scratch_operands = 0 : i64, tpu.core_type = #tpu.core_type<tc>, window_params = [{pipeline_mode = #tpu.pipeline_mode<synchronous>, transform_indices = @transform_0, window_bounds = array<i64: 128, 768>}, {pipeline_mode = #tpu.pipeline_mode<synchronous>, transform_indices = @transform_1, window_bounds = array<i64: 256, 512>}, {pipeline_mode = #tpu.pipeline_mode<synchronous>, transform_indices = @transform_2, window_bounds = array<i64: 10, 128>}, {transform_indices = @transform_3, window_bounds = array<i64: 1, 1, 128>}, {transform_indices = @transform_4, window_bounds = array<i64: 1, 16, 128>}, {transform_indices = @transform_5, window_bounds = array<i64: 1, 8, 128>}, {transform_indices = @transform_6, window_bounds = array<i64: 1, 1, 128>}]} {
    %c0 = arith.constant 0 : index
    %c0_0 = arith.constant 0 : index
    %c0_1 = arith.constant 0 : index
    %0 = vector.load %arg4[%c0, %c0_0, %c0_1] : memref<1x1x128xf32, #tpu.memory_space<vmem>>, vector<1x1x128xf32>
    %1 = vector.shape_cast %0 : vector<1x1x128xf32> to vector<1x128xf32>
    %c0_2 = arith.constant 0 : index
    %c0_3 = arith.constant 0 : index
    %c0_4 = arith.constant 0 : index
    %2 = vector.load %arg5[%c0_2, %c0_3, %c0_4] : memref<1x16x128xf32, #tpu.memory_space<vmem>>, vector<1x16x128xf32>
    %3 = vector.shape_cast %2 : vector<1x16x128xf32> to vector<16x128xf32>
    %c0_5 = arith.constant 0 : index
    %c0_6 = arith.constant 0 : index
    %c0_7 = arith.constant 0 : index
    %4 = vector.load %arg6[%c0_5, %c0_6, %c0_7] : memref<1x8x128xf32, #tpu.memory_space<vmem>>, vector<1x8x128xf32>
    %5 = vector.shape_cast %4 : vector<1x8x128xf32> to vector<8x128xf32>
    %c0_8 = arith.constant 0 : index
    %c0_9 = arith.constant 0 : index
    %6 = vector.load %arg3[%c0_8, %c0_9] : memref<10x128xf32, #tpu.memory_space<vmem>>, vector<1x128xf32>
    %c1 = arith.constant 1 : index
    %c0_10 = arith.constant 0 : index
    %7 = vector.load %arg3[%c1, %c0_10] : memref<10x128xf32, #tpu.memory_space<vmem>>, vector<1x128xf32>
    %c2 = arith.constant 2 : index
    %c0_11 = arith.constant 0 : index
    %8 = vector.load %arg3[%c2, %c0_11] : memref<10x128xf32, #tpu.memory_space<vmem>>, vector<1x128xf32>
    %c3 = arith.constant 3 : index
    %c0_12 = arith.constant 0 : index
    %9 = vector.load %arg3[%c3, %c0_12] : memref<10x128xf32, #tpu.memory_space<vmem>>, vector<1x128xf32>
    %c4 = arith.constant 4 : index
    %c0_13 = arith.constant 0 : index
    %10 = vector.load %arg3[%c4, %c0_13] : memref<10x128xf32, #tpu.memory_space<vmem>>, vector<1x128xf32>
    %c5 = arith.constant 5 : index
    %c0_14 = arith.constant 0 : index
    %11 = vector.load %arg3[%c5, %c0_14] : memref<10x128xf32, #tpu.memory_space<vmem>>, vector<1x128xf32>
    %c6 = arith.constant 6 : index
    %c0_15 = arith.constant 0 : index
    %12 = vector.load %arg3[%c6, %c0_15] : memref<10x128xf32, #tpu.memory_space<vmem>>, vector<1x128xf32>
    %c7 = arith.constant 7 : index
    %c0_16 = arith.constant 0 : index
    %13 = vector.load %arg3[%c7, %c0_16] : memref<10x128xf32, #tpu.memory_space<vmem>>, vector<1x128xf32>
    %c8 = arith.constant 8 : index
    %c0_17 = arith.constant 0 : index
    %14 = vector.load %arg3[%c8, %c0_17] : memref<10x128xf32, #tpu.memory_space<vmem>>, vector<1x128xf32>
    %c9 = arith.constant 9 : index
    %c0_18 = arith.constant 0 : index
    %15 = vector.load %arg3[%c9, %c0_18] : memref<10x128xf32, #tpu.memory_space<vmem>>, vector<1x128xf32>
    %16 = arith.truncf %1 : vector<1x128xf32> to vector<1x128xbf16>
    %c0_19 = arith.constant 0 : index
    %c256 = arith.constant 256 : index
    %17 = vector.load %arg1[%c0_19, %c256] : memref<128x768xbf16, #tpu.memory_space<vmem>>, vector<128x512xbf16>
    %cst = arith.constant dense<0.000000e+00> : vector<1x512xf32>
    %18 = tpu.matmul %16, %17, %cst {dimension_numbers = #tpu.dot_dimension_numbers<[1], [0], [0], [1], [0, 0, 1, 1], [], []>} : vector<1x128xbf16>, vector<128x512xbf16>, vector<1x512xf32> -> vector<1x512xf32>
    %19 = vector.extract_strided_slice %18 {offsets = [0, 0], sizes = [1, 128], strides = [1, 1]} : vector<1x512xf32> to vector<1x128xf32>
    %20 = vector.extract_strided_slice %18 {offsets = [0, 128], sizes = [1, 128], strides = [1, 1]} : vector<1x512xf32> to vector<1x128xf32>
    %21 = vector.extract_strided_slice %18 {offsets = [0, 256], sizes = [1, 128], strides = [1, 1]} : vector<1x512xf32> to vector<1x128xf32>
    %22 = vector.extract_strided_slice %18 {offsets = [0, 384], sizes = [1, 128], strides = [1, 1]} : vector<1x512xf32> to vector<1x128xf32>
    %23 = tpu.concatenate %3, %5 in 0 : vector<16x128xf32>, vector<8x128xf32> -> vector<24x128xf32>
    %24 = arith.truncf %23 : vector<24x128xf32> to vector<24x128xbf16>
    %c0_20 = arith.constant 0 : index
    %c0_21 = arith.constant 0 : index
    %25 = vector.load %arg1[%c0_20, %c0_21] : memref<128x768xbf16, #tpu.memory_space<vmem>>, vector<128x256xbf16>
    %cst_22 = arith.constant dense<0.000000e+00> : vector<24x256xf32>
    %26 = tpu.matmul %24, %25, %cst_22 {dimension_numbers = #tpu.dot_dimension_numbers<[1], [0], [0], [1], [0, 0, 1, 1], [], []>} : vector<24x128xbf16>, vector<128x256xbf16>, vector<24x256xf32> -> vector<24x256xf32>
    %27 = vector.extract_strided_slice %26 {offsets = [0, 0], sizes = [16, 128], strides = [1, 1]} : vector<24x256xf32> to vector<16x128xf32>
    %28 = vector.broadcast %21 : vector<1x128xf32> to vector<16x128xf32>
    %29 = arith.addf %27, %28 : vector<16x128xf32>
    %30 = vector.broadcast %9 : vector<1x128xf32> to vector<16x128xf32>
    %31 = arith.addf %29, %30 : vector<16x128xf32>
    %32 = math.tanh %31 : vector<16x128xf32>
    %33 = vector.extract_strided_slice %26 {offsets = [16, 128], sizes = [8, 128], strides = [1, 1]} : vector<24x256xf32> to vector<8x128xf32>
    %34 = vector.broadcast %22 : vector<1x128xf32> to vector<8x128xf32>
    %35 = arith.addf %33, %34 : vector<8x128xf32>
    %36 = vector.broadcast %10 : vector<1x128xf32> to vector<8x128xf32>
    %37 = arith.addf %35, %36 : vector<8x128xf32>
    %38 = math.tanh %37 : vector<8x128xf32>
    %39 = vector.broadcast %6 : vector<1x128xf32> to vector<16x128xf32>
    %40 = arith.mulf %32, %39 : vector<16x128xf32>
    %cst_23 = arith.constant dense<0.000000e+00> : vector<16xf32>
    %41 = vector.multi_reduction <add>, %40, %cst_23 [1] : vector<16x128xf32> to vector<16xf32>
    %42 = vector.shape_cast %41 : vector<16xf32> to vector<16x1xf32>
    %43 = vector.broadcast %7 : vector<1x128xf32> to vector<8x128xf32>
    %44 = arith.mulf %38, %43 : vector<8x128xf32>
    %cst_24 = arith.constant dense<0.000000e+00> : vector<8xf32>
    %45 = vector.multi_reduction <add>, %44, %cst_24 [1] : vector<8x128xf32> to vector<8xf32>
    %46 = vector.shape_cast %45 : vector<8xf32> to vector<8x1xf32>
    %cst_25 = arith.constant dense<0xFF800000> : vector<1xf32>
    %47 = vector.multi_reduction <maximumf>, %42, %cst_25 [0] : vector<16x1xf32> to vector<1xf32>
    %48 = vector.shape_cast %47 : vector<1xf32> to vector<1x1xf32>
    %49 = vector.broadcast %48 : vector<1x1xf32> to vector<16x1xf32>
    %50 = arith.subf %42, %49 : vector<16x1xf32>
    %51 = math.exp %50 : vector<16x1xf32>
    %cst_26 = arith.constant dense<0.000000e+00> : vector<1xf32>
    %52 = vector.multi_reduction <add>, %51, %cst_26 [0] : vector<16x1xf32> to vector<1xf32>
    %53 = vector.shape_cast %52 : vector<1xf32> to vector<1x1xf32>
    %54 = tpu.reciprocal %53 {approx = true} : vector<1x1xf32> -> vector<1x1xf32>
    %55 = vector.broadcast %54 : vector<1x1xf32> to vector<16x1xf32>
    %56 = arith.mulf %51, %55 : vector<16x1xf32>
    %cst_27 = arith.constant dense<0xFF800000> : vector<1xf32>
    %57 = vector.multi_reduction <maximumf>, %46, %cst_27 [0] : vector<8x1xf32> to vector<1xf32>
    %58 = vector.shape_cast %57 : vector<1xf32> to vector<1x1xf32>
    %59 = vector.broadcast %58 : vector<1x1xf32> to vector<8x1xf32>
    %60 = arith.subf %46, %59 : vector<8x1xf32>
    %61 = math.exp %60 : vector<8x1xf32>
    %cst_28 = arith.constant dense<0.000000e+00> : vector<1xf32>
    %62 = vector.multi_reduction <add>, %61, %cst_28 [0] : vector<8x1xf32> to vector<1xf32>
    %63 = vector.shape_cast %62 : vector<1xf32> to vector<1x1xf32>
    %64 = tpu.reciprocal %63 {approx = true} : vector<1x1xf32> -> vector<1x1xf32>
    %65 = vector.broadcast %64 : vector<1x1xf32> to vector<8x1xf32>
    %66 = arith.mulf %61, %65 : vector<8x1xf32>
    %67 = vector.broadcast %56 : vector<16x1xf32> to vector<16x128xf32>
    %68 = arith.mulf %67, %3 : vector<16x128xf32>
    %cst_29 = arith.constant dense<0.000000e+00> : vector<128xf32>
    %69 = vector.multi_reduction <add>, %68, %cst_29 [0] : vector<16x128xf32> to vector<128xf32>
    %70 = vector.shape_cast %69 : vector<128xf32> to vector<1x128xf32>
    %71 = vector.broadcast %66 : vector<8x1xf32> to vector<8x128xf32>
    %72 = arith.mulf %71, %5 : vector<8x128xf32>
    %cst_30 = arith.constant dense<0.000000e+00> : vector<128xf32>
    %73 = vector.multi_reduction <add>, %72, %cst_30 [0] : vector<8x128xf32> to vector<128xf32>
    %74 = vector.shape_cast %73 : vector<128xf32> to vector<1x128xf32>
    %75 = tpu.concatenate %70, %74 in 1 : vector<1x128xf32>, vector<1x128xf32> -> vector<1x256xf32>
    %76 = arith.truncf %75 : vector<1x256xf32> to vector<1x256xbf16>
    %c0_31 = arith.constant 0 : index
    %c0_32 = arith.constant 0 : index
    %77 = vector.load %arg2[%c0_31, %c0_32] : memref<256x512xbf16, #tpu.memory_space<vmem>>, vector<256x512xbf16>
    %cst_33 = arith.constant dense<0.000000e+00> : vector<1x512xf32>
    %78 = tpu.matmul %76, %77, %cst_33 {dimension_numbers = #tpu.dot_dimension_numbers<[1], [0], [0], [1], [0, 0, 1, 1], [], []>} : vector<1x256xbf16>, vector<256x512xbf16>, vector<1x512xf32> -> vector<1x512xf32>
    %79 = vector.extract_strided_slice %78 {offsets = [0, 0], sizes = [1, 128], strides = [1, 1]} : vector<1x512xf32> to vector<1x128xf32>
    %80 = arith.addf %79, %12 : vector<1x128xf32>
    %81 = vector.extract_strided_slice %78 {offsets = [0, 128], sizes = [1, 128], strides = [1, 1]} : vector<1x512xf32> to vector<1x128xf32>
    %82 = arith.addf %81, %14 : vector<1x128xf32>
    %83 = arith.addf %82, %20 : vector<1x128xf32>
    %84 = vector.extract_strided_slice %78 {offsets = [0, 256], sizes = [1, 128], strides = [1, 1]} : vector<1x512xf32> to vector<1x128xf32>
    %85 = arith.addf %84, %13 : vector<1x128xf32>
    %86 = vector.extract_strided_slice %78 {offsets = [0, 384], sizes = [1, 128], strides = [1, 1]} : vector<1x512xf32> to vector<1x128xf32>
    %87 = arith.addf %86, %15 : vector<1x128xf32>
    %88 = arith.addf %87, %20 : vector<1x128xf32>
    %89 = math.tanh %83 : vector<1x128xf32>
    %90 = arith.mulf %89, %8 : vector<1x128xf32>
    %cst_34 = arith.constant dense<0.000000e+00> : vector<1xf32>
    %91 = vector.multi_reduction <add>, %90, %cst_34 [1] : vector<1x128xf32> to vector<1xf32>
    %92 = vector.shape_cast %91 : vector<1xf32> to vector<1x1xf32>
    %93 = math.tanh %88 : vector<1x128xf32>
    %94 = arith.mulf %93, %8 : vector<1x128xf32>
    %cst_35 = arith.constant dense<0.000000e+00> : vector<1xf32>
    %95 = vector.multi_reduction <add>, %94, %cst_35 [1] : vector<1x128xf32> to vector<1xf32>
    %96 = vector.shape_cast %95 : vector<1xf32> to vector<1x1xf32>
    %97 = arith.subf %96, %92 : vector<1x1xf32>
    %98 = math.exp %97 : vector<1x1xf32>
    %cst_36 = arith.constant 1.000000e+00 : f32
    %99 = vector.broadcast %cst_36 : f32 to vector<1x1xf32>
    %100 = arith.addf %99, %98 : vector<1x1xf32>
    %101 = tpu.reciprocal %100 {approx = true} : vector<1x1xf32> -> vector<1x1xf32>
    %cst_37 = arith.constant 1.000000e+00 : f32
    %102 = vector.broadcast %cst_37 : f32 to vector<1x1xf32>
    %103 = arith.subf %102, %101 : vector<1x1xf32>
    %104 = vector.broadcast %101 : vector<1x1xf32> to vector<1x128xf32>
    %105 = arith.mulf %104, %80 : vector<1x128xf32>
    %106 = arith.addf %19, %105 : vector<1x128xf32>
    %107 = vector.broadcast %103 : vector<1x1xf32> to vector<1x128xf32>
    %108 = arith.mulf %107, %85 : vector<1x128xf32>
    %109 = arith.addf %106, %108 : vector<1x128xf32>
    %110 = arith.addf %109, %11 : vector<1x128xf32>
    %111 = math.tanh %110 : vector<1x128xf32>
    %112 = vector.shape_cast %111 : vector<1x128xf32> to vector<1x1x128xf32>
    %c0_38 = arith.constant 0 : index
    %c0_39 = arith.constant 0 : index
    %c0_40 = arith.constant 0 : index
    %113 = vector.load %arg7[%c0_38, %c0_39, %c0_40] : memref<1x1x128xf32, #tpu.memory_space<vmem>>, vector<1x1x128xf32>
    tpu.vector_store %arg7[%c0_38, %c0_39, %c0_40], %112 {strides = array<i32>} : memref<1x1x128xf32, #tpu.memory_space<vmem>>, vector<1x1x128xf32>,
    return
  }
  func.func @transform_0(%arg0: i32) -> (i32, i32) {
    %c0_i32 = arith.constant 0 : i32
    %c0_i32_0 = arith.constant 0 : i32
    %c0_i32_1 = arith.constant 0 : i32
    return %c0_i32, %c0_i32_0 : i32, i32
  }
  func.func @transform_1(%arg0: i32) -> (i32, i32) {
    %c0_i32 = arith.constant 0 : i32
    %c0_i32_0 = arith.constant 0 : i32
    %c0_i32_1 = arith.constant 0 : i32
    return %c0_i32, %c0_i32_0 : i32, i32
  }
  func.func @transform_2(%arg0: i32) -> (i32, i32) {
    %c0_i32 = arith.constant 0 : i32
    %c0_i32_0 = arith.constant 0 : i32
    %c0_i32_1 = arith.constant 0 : i32
    return %c0_i32, %c0_i32_0 : i32, i32
  }
  func.func @transform_3(%arg0: i32) -> (i32, i32, i32) {
    %c0_i32 = arith.constant 0 : i32
    %c0_i32_0 = arith.constant 0 : i32
    %c0_i32_1 = arith.constant 0 : i32
    return %arg0, %c0_i32, %c0_i32_0 : i32, i32, i32
  }
  func.func @transform_4(%arg0: i32) -> (i32, i32, i32) {
    %c0_i32 = arith.constant 0 : i32
    %c0_i32_0 = arith.constant 0 : i32
    %c0_i32_1 = arith.constant 0 : i32
    return %arg0, %c0_i32, %c0_i32_0 : i32, i32, i32
  }
  func.func @transform_5(%arg0: i32) -> (i32, i32, i32) {
    %c0_i32 = arith.constant 0 : i32
    %c0_i32_0 = arith.constant 0 : i32
    %c0_i32_1 = arith.constant 0 : i32
    return %arg0, %c0_i32, %c0_i32_0 : i32, i32, i32
  }
  func.func @transform_6(%arg0: i32) -> (i32, i32, i32) {
    %c0_i32 = arith.constant 0 : i32
    %c0_i32_0 = arith.constant 0 : i32
    %c0_i32_1 = arith.constant 0 : i32
    return %arg0, %c0_i32, %c0_i32_0 : i32, i32, i32
  }
}

</mosaic_0001>

<bundles_post_ra>
// kernel: tpu_custom_call.1
= control target key start
LH: loop header
LB: loop body
LE: loop exit
PB: predicated region body
PF: predicated region fallthrough
CT: control target
= control target key end

     0   :  { %s2472_s0 = inlined_call_operand.hbm [shape: bf16[128,768], index: 0, kind: input, shape index: {}]   ;;  %s2473_s1 = inlined_call_operand.hbm [shape: bf16[256,512], index: 1, kind: input, shape index: {}]   ;;  %s2474_s2 = inlined_call_operand.hbm [shape: f32[10,128], index: 2, kind: input, shape index: {}]   ;;  %s2475_s3 = inlined_call_operand.vmem [shape: f32[4,1,128], index: 3, kind: input, shape index: {}]   ;;  %s2476_s4 = inlined_call_operand.hbm [shape: f32[4,16,128], index: 4, kind: input, shape index: {}]   ;;  %s2477_s5 = inlined_call_operand.hbm [shape: f32[4,8,128], index: 5, kind: input, shape index: {}]   ;;  %s2478_s6 = inlined_call_operand.hbm [shape: f32[4,1,128], index: 6, kind: output, shape index: {}]  }
   0x1   :  { %2488 = sst [smem:[#allocation18_spill]] %s2472_s0 }
   0x2   :  { %2489 = sst [smem:[#allocation19_spill]] %s2473_s1 }
   0x3   :  { %2490 = sst [smem:[#allocation20_spill]] %s2476_s4 }
   0x4   :  { %11 = vsyncpa [#allocation3], 0 }
   0x5   :  { %12 = vsyncpa [#allocation6], 0 }
   0x6   :  { %13 = vsyncpa [#allocation9], 0 }
   0x7   :  { %15 = vsyncpa [#allocation9 + $0x1], 0 }
   0x8   :  { %16 = vsyncpa [#allocation4], 0 }
   0x9   :  { %18 = vsyncpa [#allocation4 + $0x1], 0  ;;  %s2208_s21 = smov 0   ;;  %s2210_s22 = smov 0  }
   0xa   :  { %s2212_s23 = smov 0   ;;  %s2214_s24 = smov 0  }
   0xb LB: > { %2491 = sst [smem:[#allocation16_spill]] %s2154_s23  ;;  %s2229_s25 = sadd.s32 4294967295, %s2158_s24   ;;  %s2158_s24 = sphi %s2214_s24, %s2519_s24   ;;  %s2154_s23 = sphi %s2212_s23, %s2516_s23   ;;  %s2150_s22 = sphi %s2210_s22, %s2518_s22   ;;  %s2146_s21 = sphi %s2208_s21, %s2517_s21  }
   0xc   : > { %s1532_s26 = sadd.s32 4294967294, %s2158_s24   ;;  %p133_p0 = scmp.ne.s32.totalorder %s2150_s22, %s2146_s21 }
   0xd   : > { %p2480_p1 = scmp.eq.s32.totalorder %s2229_s25, 0  ;;  %p183_p2 = scmp.eq.s32.totalorder %s2229_s25, 3 }
   0xe   : > { %p189_p3 = scmp.eq.s32.totalorder %s1532_s26, 3  ;;  %p1533_p5 = scmp.ge.s32.totalorder %s2158_s24, 1 }
   0xf   : > { %p2238_p4 = por %p2480_p1, %p133_p0  ;;  %p196_p7 = scmp.lt.s32.totalorder %s2158_s24, 5 }
  0x10   : > { %p2243_p6 = por %p189_p3, %p133_p0  ;;  %s2160_s30 = smov [#allocation5]  }
  0x11   : > { %s2492_s27 = scalar_select %p2238_p4, 1, 0 }
  0x12   : > { %s2493_s28 = scalar_select %p2243_p6, 1, 0 }
  0x13   : > { %p2248_p8 = pnand %p1533_p5, %p196_p7  ;;  %s221_s7 = sshll.u32 %s2160_s30, 4  ;;  %s222_s7 = int_to_ptr.vmem [resolvable:$true] %s221_s7 }
  0x14   : > { %s2261_s9 = sadd.s32 1, %s2158_s24   ;;  %s120_s10 = sadd.s32 1, %s2154_s23 }
  0x15   : > { %s2494_s29 = scalar_select %p2248_p8, 1, 0 }
  0x16   : > { %p1687_p9 = pneg %p2248_p8  ;;  %s117_s11 = ssub.s32 %s2158_s24, %s2261_s9 }
  0x17   : > { %s1963_s12 = scalar_lea.vmem %s222_s7, 8192  ;;  %p1971_p3 = scmp.lt.s32.totalorder %s222_s7, %s222_s7 }
  0x18   : > { %p2256_p10 = pnand %p1687_p9, %p2480_p1  ;;  %p1964_p12 = scmp.ne.s32.totalorder %s222_s7, %s1963_s12 }
  0x19   : > { %p1972_p5 = scmp.lt.s32.totalorder %s1963_s12, %s1963_s12 }
  0x1a   : > { %p2481_p11 = pneg %p2256_p10 }
  0x1b   : > { %p1973_p7 = por %p1972_p5, %p1971_p3 }
  0x1c   : > { %p1966_p13 = pnand %p1964_p12, %p2481_p11 }
  0x1e   : > { %p1967_p0 = pneg %p1966_p13 }
  0x20   : > { %p1974_p9 = pnand %p1973_p7, %p1967_p0 }
  0x22   : > { %1977 = shalt.err (!%p1974_p9)
}
  0x23   : > { %s2161_s13 = smov 256   ;;  %s2162_s14 = smov 16  }
  0x24   : > { %s2496_s1 = sld [smem:[#allocation19_spill]]  ;;  %p118_p12 = scmp.eq.s32.totalorder %s117_s11, 0 }
  0x25   : > { %p127_p13 = scmp.ne.s32.totalorder %s2154_s23, %s2150_s22  ;;  %p128_p0 = scmp.eq.s32.totalorder %s2158_s24, 0 }
  0x26   : > { %s2280_s17 = scalar_select %p118_p12, %s2154_s23, %s120_s10  }
  0x27   : > { %p129_p3 = por %p128_p0, %p127_p13  ;;  %p2284_p5 = por %p183_p2, %p127_p13 }
  0x28   : > { %2497 = sst [smem:[#allocation17_spill]] %s2280_s17  ;;  %p1711_p7 = scmp.lt.s32.totalorder %s2158_s24, 4 }
  0x29   : > { %s2498_s18 = scalar_select %p2284_p5, 1, 0 }
  0x2a   : > { %1693 = dma.hbm_to_vmem [thread:$0]  (!%p2256_p10), %s2496_s1, 8192, %s222_s7, [#allocation6], %s2161_s13, %s2161_s13, %s2162_s14  }
  0x2b   : > { %s254_s19 = sand.u32 1, %s2158_s24   ;;  %s2479_s20 = sand.u32 1, %s2154_s23  }
  0x2c   : > { %s1538_s26 = sshll.u32 %s2479_s20, 4  ;;  %s1668_s30 = sshll.u32 %s2158_s24, 8 }
  0x2d   : > { %s2499_s4 = sld [smem:[#allocation20_spill]]  ;;  %s258_s10 = scalar_lea.vmem [#allocation8], %s1538_s26 }
  0x2e   : > { %s265_s11 = sshll.u32 %s258_s10, 4  ;;  %p2301_p2 = pnand %p1711_p7, %p129_p3  ;;  %s2299_s11 = int_to_ptr.vmem [resolvable:$true] %s265_s11 }
  0x2f   : > { %s2163_s14 = smov [#allocation2]   ;;  %s2307_s20 = scalar_lea.sflag [#allocation9], %s254_s19 }
  0x30   : > { %s2305_s16 = sshll.u32 %s2163_s14, 4  ;;  %p1980_p12 = pneg %p2301_p2  ;;  %s209_s16 = int_to_ptr.vmem [resolvable:$true] %s2305_s16 }
  0x33   : > { %s2297_s7 = scalar_lea.hbm %s2499_s4, %s1668_s30  ;;  %s1983_s15 = scalar_lea.hbm %s2499_s4, 1024 }
  0x34   : > { %s1978_s30 = scalar_lea.hbm %s2297_s7, 256  ;;  %p1984_p3 = scmp.lt.s32.totalorder %s2297_s7, %s2499_s4 }
  0x35   : > { %p1979_p9 = scmp.ne.s32.totalorder %s2297_s7, %s1978_s30  ;;  %p1985_p7 = scmp.lt.s32.totalorder %s1983_s15, %s1978_s30 }
  0x37   : > { %p1981_p13 = pnand %p1980_p12, %p1979_p9  ;;  %p1986_p1 = por %p1985_p7, %p1984_p3 }
  0x39   : > { %p1982_p0 = pneg %p1981_p13 }
  0x3b   : > { %p1987_p11 = pnand %p1986_p1, %p1982_p0 }
  0x3d   : > { %1990 = shalt.err (!%p1987_p11)
}
  0x3e   : > { %s1991_s19 = scalar_lea.vmem %s2299_s11, 256  ;;  %s2164_s14 = smov [#allocation8]  }
  0x3f   : > { %p1992_p6 = scmp.ne.s32.totalorder %s2299_s11, %s1991_s19  ;;  %s1996_s26 = sshll.u32 %s2164_s14, 4  ;;  %s1997_s26 = int_to_ptr.vmem [resolvable:$false] %s1996_s26 }
  0x40   : > { %s1998_s12 = scalar_lea.vmem %s1997_s26, 512  ;;  %p1999_p5 = scmp.lt.s32.totalorder %s2299_s11, %s1997_s26 }
  0x41   : > { %p1994_p9 = pnand %p1992_p6, %p1980_p12  ;;  %p2000_p4 = scmp.lt.s32.totalorder %s1998_s12, %s1991_s19 }
  0x43   : > { %p1995_p13 = pneg %p1994_p9  ;;  %p2001_p8 = por %p2000_p4, %p1999_p5 }
  0x45   : > { %p2002_p3 = pnand %p2001_p8, %p1995_p13 }
  0x47   : > { %2005 = shalt.err (!%p2002_p3)
}
  0x48   : > { %s2485_s1 = smov 128   ;;  %s2486_s30 = smov 8  }
  0x49   : > { %1700 = dma.hbm_to_vmem [thread:$0]  (!%p2301_p2), %s2297_s7, 256, %s2299_s11, %s2307_s20, %s2485_s1, %s2485_s1, %s2486_s30  }
  0x4a   : > { %s2017_s15 = scalar_lea.vmem %s209_s16, 6144  ;;  %p2501_p4 = pneg %p2256_p10 }
  0x4b   : > { %p2018_p1 = scmp.ne.s32.totalorder %s209_s16, %s2017_s15  ;;  %p2025_p11 = scmp.lt.s32.totalorder %s209_s16, %s209_s16 }
  0x4c   : > { %p2026_p5 = scmp.lt.s32.totalorder %s2017_s15, %s2017_s15 }
  0x4d   : > { %p2020_p6 = pnand %p2018_p1, %p2501_p4 }
  0x4e   : > { %p2027_p0 = por %p2026_p5, %p2025_p11 }
  0x4f   : > { %p2021_p8 = pneg %p2020_p6 }
  0x51   : > { %p2028_p7 = pnand %p2027_p0, %p2021_p8 }
  0x53   : > { %2031 = shalt.err (!%p2028_p7)
}
  0x54   : > { %s2167_s10 = smov 384   ;;  %s2168_s19 = smov 24  }
  0x55   : > { %s2502_s0 = sld [smem:[#allocation18_spill]]  ;;  %s2503_s14 = sand.u32 1, %s2154_s23  }
  0x56   : > { %s1541_s26 = sshll.u32 %s2503_s14, 3  ;;  %s2169_s12 = smov [#allocation7]  }
  0x57   : > { %s234_s1 = sshll.u32 %s2169_s12, 4  ;;  %s1542_s15 = sshll.u32 %s2158_s24, 7  ;;  %s235_s1 = int_to_ptr.vmem [resolvable:$true] %s234_s1 }
  0x58   : > { %s2043_s30 = scalar_lea.vmem %s235_s1, 256  ;;  %p2504_p13 = pmov %p2501_p4 }
  0x59   : > { %p2044_p9 = scmp.ne.s32.totalorder %s235_s1, %s2043_s30  ;;  %p2051_p4 = scmp.lt.s32.totalorder %s235_s1, %s235_s1 }
  0x5a   : > { %p2052_p6 = scmp.lt.s32.totalorder %s2043_s30, %s2043_s30 }
  0x5b   : > { %1690 = dma.hbm_to_vmem [thread:$0]  (!%p2256_p10), %s2502_s0, 6144, %s209_s16, [#allocation3], %s2167_s10, %s2167_s10, %s2168_s19  }
  0x5c   : > { %p2046_p3 = pnand %p2044_p9, %p2504_p13  ;;  %p2053_p8 = por %p2052_p6, %p2051_p4 }
  0x5e   : > { %p2047_p1 = pneg %p2046_p3 }
  0x60   : > { %p2054_p11 = pnand %p2053_p8, %p2047_p1 }
  0x62   : > { %2057 = shalt.err (!%p2054_p11)
}
  0x63   : > { %s2505_s16 = smov 8   ;;  %s2506_s10 = smov 128  }
  0x64   : > { %1696 = dma.hbm_to_vmem [thread:$0]  (!%p2256_p10), %s2474_s2, 256, %s235_s1, [#allocation6], %s2506_s10, %s2506_s10, %s2505_s16  }
  0x65   : > { %s284_s12 = scalar_lea.hbm %s2477_s5, %s1542_s15  ;;  %s279_s0 = scalar_lea.vmem [#allocation10], %s1541_s26 }
  0x66   : > { %s286_s4 = sshll.u32 %s279_s0, 4  ;;  %s2058_s30 = scalar_lea.hbm %s284_s12, 128  ;;  %s287_s4 = int_to_ptr.vmem [resolvable:$true] %s286_s4 }
  0x67   : > { %p2059_p5 = scmp.ne.s32.totalorder %s284_s12, %s2058_s30  ;;  %s2063_s23 = scalar_lea.hbm %s2477_s5, 512 }
  0x68   : > { %p2064_p10 = scmp.lt.s32.totalorder %s284_s12, %s2477_s5  ;;  %p2065_p9 = scmp.lt.s32.totalorder %s2063_s23, %s2058_s30 }
  0x69   : > { %p2061_p0 = pnand %p2059_p5, %p1980_p12 }
  0x6a   : > { %p2066_p13 = por %p2065_p9, %p2064_p10 }
  0x6b   : > { %p2062_p7 = pneg %p2061_p0 }
  0x6d   : > { %p2067_p3 = pnand %p2066_p13, %p2062_p7 }
  0x6f   : > { %2070 = shalt.err (!%p2067_p3)
}
  0x70   : > { %s2071_s0 = scalar_lea.vmem %s287_s4, 128  ;;  %s2170_s1 = smov [#allocation10]  }
  0x71   : > { %p2072_p1 = scmp.ne.s32.totalorder %s287_s4, %s2071_s0  ;;  %s2076_s26 = sshll.u32 %s2170_s1, 4  ;;  %s2077_s26 = int_to_ptr.vmem [resolvable:$false] %s2076_s26 }
  0x72   : > { %s2078_s17 = scalar_lea.vmem %s2077_s26, 256  ;;  %p2079_p8 = scmp.lt.s32.totalorder %s287_s4, %s2077_s26 }
  0x73   : > { %p2074_p4 = pnand %p2072_p1, %p1980_p12  ;;  %p2080_p11 = scmp.lt.s32.totalorder %s2078_s17, %s2071_s0 }
  0x75   : > { %p2075_p6 = pneg %p2074_p4  ;;  %p2081_p5 = por %p2080_p11, %p2079_p8 }
  0x77   : > { %p2082_p0 = pnand %p2081_p5, %p2075_p6 }
  0x79   : > { %2085 = shalt.err (!%p2082_p0)
}
  0x7a   : > { %1703 = dma.hbm_to_vmem [thread:$0]  (!%p2301_p2), %s284_s12, 128, %s287_s4, %s2307_s20  }
  0x7b   : > { %p2507_p7 = scmp.ne.s32.totalorder %s2494_s29, 0 }
  0x7c   : > { %p2508_p10 = scmp.eq.s32.totalorder (!%p2507_p7), %s2229_s25, 0 }
  0x7d   : > { %295 = sbr.rel (%p2507_p7) target bundleno = 1065 (0x429), region = 44 }
  0x82   : > { %2129 = dma.done.wait (%p2508_p10), [#allocation3], 6144   ;;  %p2509_p12 = pmov %p2508_p10 }
  0x83   : > { %p2510_p9 = pmov %p2508_p10 }
  0x84   : > { %2131 = vsyncadd (%p2509_p12), [#allocation3], 4294961152 }
  0x85   : > { %2133 = dma.done.wait (%p2510_p9), [#allocation6], 8448   ;;  %p2511_p13 = pmov %p2510_p9 }
  0x86   : > { %s309_s23 = sand.u32 1, %s2229_s25   ;;  %s2390_s4 = sand.u32 1, %s2150_s22  }
  0x87   : > { %2135 = vsyncadd (%p2511_p13), [#allocation6], 4294958848  ;;  %s1547_s29 = sshll.u32 %s2390_s4, 4  ;;  %s310_s20 = scalar_lea.sflag [#allocation9], %s309_s23 }
  0x88   : > { %s2393_s13 = scalar_lea.vmem [#allocation8], %s1547_s29  ;;  %p2512_p2 = scmp.ne.s32.totalorder %s2492_s27, 0 }
  0x8a   : > { %2137 = dma.done.wait (%p2512_p2), %s310_s20, 384  }
  0x8b   : > { %2139 = vsyncadd (%p2512_p2), %s310_s20, 4294966912  ;;  %v2171_v0 = vmov 0   ;;  %v1758_v1 = vld [vmem:[#allocation2 + $0x15c] ss:$24 sps:$4 sm:$0xff]   ;;  %v1760_v2 = vld [vmem:[#allocation2 + $0x158] ss:$24 sps:$4 sm:$0xff]  }
  0x8c   : > { %601 = vmatprep.mubr.bf16.mxu0 %v2171_v0  ;;  %642 = vmatprep.mubr.bf16.mxu1 %v2171_v0  ;;  %v1761_v3 = vld [vmem:[#allocation2 + $0x12c] ss:$24 sps:$4 sm:$0xff]   ;;  %v1763_v4 = vld [vmem:[#allocation2 + $0x128] ss:$24 sps:$4 sm:$0xff]   ;;  %v1764_v5 = vld [vmem:[#allocation2 + $0xfc] ss:$24 sps:$4 sm:$0xff]  }
  0x8d   : > { %569 = vmatprep.subr.bf16.mxu0 %v1758_v1  ;;  %v1766_v6 = vld [vmem:[#allocation2 + $0xf8] ss:$24 sps:$4 sm:$0xff]   ;;  %v1767_v7 = vld [vmem:[#allocation2 + $0xcc] ss:$24 sps:$4 sm:$0xff]   ;;  %v1769_v10 = vld [vmem:[#allocation2 + $0xc8] ss:$24 sps:$4 sm:$0xff]   ;;  %v797_v1 = vlaneseq }
  0x8e   : > { %570 = vmatpush1.bf16.msra.mxu0 %v1760_v2  ;;  %v1779_v8 = vld [vmem:[#allocation2 + $0x164] ss:$24 sps:$4 sm:$0xff]   ;;  %v1781_v9 = vld [vmem:[#allocation2 + $0x160] ss:$24 sps:$4 sm:$0xff]   ;;  %v1785_v12 = vld [vmem:[#allocation2 + $0x134] ss:$24 sps:$4 sm:$0xff]  }
  0x8f   : > { %571 = vmatprep.subr.bf16.mxu0 %v1761_v3  ;;  %v1770_v11 = vld [vmem:[#allocation2 + $0x9c] ss:$24 sps:$4 sm:$0xff]   ;;  %610 = vmatprep.subr.bf16.mxu1 %v1779_v8  ;;  %v1787_v13 = vld [vmem:[#allocation2 + $0x130] ss:$24 sps:$4 sm:$0xff]   ;;  %v1773_v16 = vld [vmem:[#allocation2 + $0x6c] ss:$24 sps:$4 sm:$0xff]  }
  0x90   : > { %611 = vmatpush1.bf16.msra.mxu1 %v1781_v9  ;;  %v1772_v14 = vld [vmem:[#allocation2 + $0x98] ss:$24 sps:$4 sm:$0xff]   ;;  %v1791_v15 = vld [vmem:[#allocation2 + $0x104] ss:$24 sps:$4 sm:$0xff]   ;;  %p358_p3 = scmp.lt.s32.totalorder %s2229_s25, 3  ;;  %s1548_s11 = sshll.u32 %s2390_s4, 3 }
  0x91   : > { %612 = vmatprep.subr.bf16.mxu1 %v1785_v12  ;;  %v1793_v17 = vld [vmem:[#allocation2 + $0x100] ss:$24 sps:$4 sm:$0xff]   ;;  %v1797_v18 = vld [vmem:[#allocation2 + $0xd4] ss:$24 sps:$4 sm:$0xff]   ;;  %v1799_v21 = vld [vmem:[#allocation2 + $0xd0] ss:$24 sps:$4 sm:$0xff]  }
  0x92   : > { %572 = vmatpush1.bf16.msra.mxu0 %v1763_v4  ;;  %v1775_v19 = vld [vmem:[#allocation2 + $0x68] ss:$24 sps:$4 sm:$0xff]   ;;  %v1776_v20 = vld [vmem:[#allocation2 + $0x3c] ss:$24 sps:$4 sm:$0xff]   ;;  %s359_s27 = scalar_select %p358_p3, %s2229_s25, 3  ;;  %v798_v2 = vshrl.u32 %v797_v1, 7 }
  0x93   : > { %573 = vmatprep.subr.bf16.mxu0 %v1764_v5  ;;  %v1803_v22 = vld [vmem:[#allocation2 + $0xa4] ss:$24 sps:$4 sm:$0xff]   ;;  %v1778_v23 = vld [vmem:[#allocation2 + $0x38] ss:$24 sps:$4 sm:$0xff]   ;;  %v1784_v26 = vld [vmem:[#allocation2 + $0x8] ss:$24 sps:$4 sm:$0xff]  }
  0x94   : > { %613 = vmatpush1.bf16.msra.mxu1 %v1787_v13  ;;  %v1782_v24 = vld [vmem:[#allocation2 + $0xc] ss:$24 sps:$4 sm:$0xff]   ;;  %s360_s10 = scalar_lea.vmem %s2475_s3, %s359_s27  ;;  %v1805_v25 = vld [vmem:[#allocation2 + $0xa0] ss:$24 sps:$4 sm:$0xff]   ;;  %v1811_v30 = vld [vmem:[#allocation2 + $0x70] ss:$24 sps:$4 sm:$0xff]  }
  0x95   : > { %614 = vmatprep.subr.bf16.mxu1 %v1791_v15  ;;  %v1809_v27 = vld [vmem:[#allocation2 + $0x74] ss:$24 sps:$4 sm:$0xff]   ;;  %v362_v28 = vld [vmem:[%s360_s10] sm:$0x1]  ;;  %v1815_v32 = vld [vmem:[#allocation2 + $0x44] ss:$24 sps:$4 sm:$0xff]  }
  0x96   : > { %574 = vmatpush1.bf16.msra.mxu0 %v1766_v6  ;;  %v1790_v29 = vld [vmem:[#allocation2 + $0x154] ss:$24 sps:$4 sm:$0xff]   ;;  %v376_v31 = vpack.c.bf16 %v362_v28, %v362_v28  ;;  %v1788_v33 = vld [vmem:[#allocation2 + $0x150] ss:$24 sps:$4 sm:$0xff]   ;;  %v1796_v34 = vld [vmem:[#allocation2 + $0x124] ss:$24 sps:$4 sm:$0xff]  }
  0x97   : > { %575 = vmatprep.subr.bf16.mxu0 %v1767_v7  ;;  %v1817_v35 = vld [vmem:[#allocation2 + $0x40] ss:$24 sps:$4 sm:$0xff]   ;;  %v1821_v37 = vld [vmem:[#allocation2 + $0x14] ss:$24 sps:$4 sm:$0xff]   ;;  %v1823_v39 = vld [vmem:[#allocation2 + $0x10] ss:$24 sps:$4 sm:$0xff]  }
  0x98   : > { %615 = vmatpush1.bf16.msra.mxu1 %v1793_v17  ;;  %v1794_v36 = vld [vmem:[#allocation2 + $0x120] ss:$24 sps:$4 sm:$0xff]   ;;  %v1802_v38 = vld [vmem:[#allocation2 + $0xf4] ss:$24 sps:$4 sm:$0xff]   ;;  %v1800_v40 = vld [vmem:[#allocation2 + $0xf0] ss:$24 sps:$4 sm:$0xff]  }
  0x99   : > { %616 = vmatprep.subr.bf16.mxu1 %v1797_v18  ;;  %v1808_v41 = vld [vmem:[#allocation2 + $0xc4] ss:$24 sps:$4 sm:$0xff]   ;;  %v1806_v42 = vld [vmem:[#allocation2 + $0xc0] ss:$24 sps:$4 sm:$0xff]   ;;  %v1814_v43 = vld [vmem:[#allocation2 + $0x94] ss:$24 sps:$4 sm:$0xff]  }
  0x9a   : > { %576 = vmatpush1.bf16.msra.mxu0 %v1769_v10  ;;  %v1812_v44 = vld [vmem:[#allocation2 + $0x90] ss:$24 sps:$4 sm:$0xff]   ;;  %v1820_v45 = vld [vmem:[#allocation2 + $0x64] ss:$24 sps:$4 sm:$0xff]   ;;  %v1818_v46 = vld [vmem:[#allocation2 + $0x60] ss:$24 sps:$4 sm:$0xff]  }
  0x9b   : > { %577 = vmatprep.subr.bf16.mxu0 %v1770_v11  ;;  %v1826_v47 = vld [vmem:[#allocation2 + $0x34] ss:$24 sps:$4 sm:$0xff]   ;;  %v1824_v48 = vld [vmem:[#allocation2 + $0x30] ss:$24 sps:$4 sm:$0xff]   ;;  %v1829_v49 = vld [vmem:[#allocation2 + $0x4] ss:$24 sps:$4 sm:$0xff]  }
  0x9c   : > { %617 = vmatpush1.bf16.msra.mxu1 %v1799_v21  ;;  %v1827_v50 = vld [vmem:[#allocation2] ss:$24 sps:$4 sm:$0xff]   ;;  %s322_s14 = scalar_lea.vmem [#allocation10], %s1548_s11  ;;  %v1598_v15 = vld [vmem:[#allocation7 + $0x4] ss:$0 sm:$0xff]  ;;  %vm1371_vm0 = vcmask 1040384  }
  0x9d   : > { %618 = vmatprep.subr.bf16.mxu1 %v1803_v22  ;;  %v2408_v51 = vld [vmem:[%s2393_s13] sm:$0xff]  ;;  %v2411_v52 = vld [vmem:[%s2393_s13 + $0x8] sm:$0xff]  ;;  %s1665_s12 = sshll.u32 %s2229_s25, 4  ;;  %s357_s30 = scalar_lea.vmem [#allocation11], %s2390_s4 }
  0x9e   : > { %578 = vmatpush1.bf16.msra.mxu0 %v1772_v14  ;;  %v651_v53 = vpack.c.bf16 %v2411_v52, %v2408_v51  ;;  %v2417_v54 = vld [vmem:[%s322_s14] sm:$0xff]  ;;  %v1597_v4 = vld [vmem:[#allocation7 + $0x3] ss:$0 sm:$0xff]  ;;  %v1599_v21 = vld [vmem:[#allocation7] ss:$0 sm:$0xff]  ;;  %s1406_s8 = sshll.u32 %s357_s30, 4  ;;  %s2436_s0 = scalar_lea.hbm %s2478_s6, %s1665_s12  ;;  %s1407_s8 = int_to_ptr.vmem [resolvable:$true] %s1406_s8 }
  0x9f   : > { %579 = vmatprep.subr.bf16.mxu0 %v1773_v16  ;;  %v652_v55 = vpack.c.bf16 %v2417_v54, %v2417_v54  ;;  %v1872_v1 = vld [vmem:[#allocation5] ss:$16 sps:$4 sm:$0xff]   ;;  %s1394_s1 = scalar_lea.sflag [#allocation4], %s2390_s4  ;;  %s2086_s26 = scalar_lea.vmem %s1407_s8, 16 }
  0xa0   : > { %619 = vmatpush1.bf16.msra.mxu1 %v1805_v25  ;;  %p2087_p1 = scmp.ne.s32.totalorder %s1407_s8, %s2086_s26  ;;  %p2513_p4 = scmp.ne.s32.totalorder %s2498_s18, 0 }
  0xa1   : > { %620 = vmatprep.subr.bf16.mxu1 %v1809_v27  ;;  %s2172_s17 = smov [#allocation11]  }
  0xa2   : > { %580 = vmatpush1.bf16.msra.mxu0 %v1775_v19  ;;  %p2088_p6 = pnand %p2087_p1, %p2513_p4  ;;  %s2090_s23 = sshll.u32 %s2172_s17, 4  ;;  %s2091_s23 = int_to_ptr.vmem [resolvable:$false] %s2090_s23 }
  0xa3   : > { %581 = vmatprep.subr.bf16.mxu0 %v1776_v20  ;;  %s2092_s25 = scalar_lea.vmem %s2091_s23, 32  ;;  %p2093_p11 = scmp.lt.s32.totalorder %s1407_s8, %s2091_s23 }
  0xa4   : > { %621 = vmatpush1.bf16.msra.mxu1 %v1811_v30  ;;  %v1835_v30 = vld [vmem:[#allocation5 + $0xec] ss:$16 sps:$4 sm:$0xff]   ;;  %p2089_p8 = pneg %p2088_p6  ;;  %p2094_p5 = scmp.lt.s32.totalorder %s2092_s25, %s2086_s26 }
  0xa5   : > { %622 = vmatprep.subr.bf16.mxu1 %v1815_v32  ;;  %v1833_v32 = vld [vmem:[#allocation5 + $0xe8] ss:$16 sps:$4 sm:$0xff]  }
  0xa6   : > { %582 = vmatpush1.bf16.msra.mxu0 %v1778_v23  ;;  %p2095_p0 = por %p2094_p5, %p2093_p11 }
  0xa7   : > { %583 = vmatprep.subr.bf16.mxu0 %v1782_v24 }
  0xa8   : > { %623 = vmatpush1.bf16.msra.mxu1 %v1817_v35  ;;  %v1836_v35 = vld [vmem:[#allocation5 + $0xc0] ss:$16 sps:$4 sm:$0xff]   ;;  %p2096_p7 = pnand %p2095_p0, %p2089_p8 }
  0xa9   : > { %624 = vmatprep.subr.bf16.mxu1 %v1821_v37  ;;  %v1844_v37 = vld [vmem:[#allocation5 + $0xa4] ss:$16 sps:$4 sm:$0xff]  }
  0xaa   : > { %584 = vmatpush1.bf16.msra.mxu0 %v1784_v26  ;;  %v1600_v26 = vld [vmem:[#allocation7 + $0x1] ss:$0 sm:$0xff] }
  0xab   : > { %749 = vmatprep.subr.bf16.mxu0 %v1790_v29  ;;  %v1832_v29 = vld [vmem:[#allocation5 + $0xe4] ss:$16 sps:$4 sm:$0xff]  }
  0xac   : > { %625 = vmatpush1.bf16.msra.mxu1 %v1823_v39  ;;  %v1842_v39 = vld [vmem:[#allocation5 + $0xa0] ss:$16 sps:$4 sm:$0xff]  }
  0xad   : > { %602 = vmatmul.mubr.bf16.vlgmr.msra.gmra.mxu0 %v376_v31  ;;  %1281 = vmatprep.subr.bf16.mxu1 %v1832_v29  ;;  %v1917_v29 = vld [vmem:[#allocation5 + $0x128] ss:$16 sps:$4 sm:$0xff]  }
  0xae   : > { %750 = vmatpush1.bf16.msra.mxu0 %v1788_v33  ;;  %781 = vmatprep.mubr.bf16.mxu0 %v2171_v0  ;;  %v1838_v33 = vld [vmem:[#allocation5 + $0xc4] ss:$16 sps:$4 sm:$0xff]  }
  0xaf   : > { %751 = vmatprep.subr.bf16.mxu0 %v1796_v34  ;;  %643 = vmatmul.mubr.bf16.vlgmr.msra.gmra.mxu1 %v376_v31  ;;  %v1830_v31 = vld [vmem:[#allocation5 + $0xe0] ss:$16 sps:$4 sm:$0xff]   ;;  %v1841_v34 = vld [vmem:[#allocation5 + $0xcc] ss:$16 sps:$4 sm:$0xff]  }
  0xb0   : > { %1282 = vmatpush1.bf16.msra.mxu1 %v1830_v31  ;;  %v1925_v31 = vld [vmem:[#allocation5 + $0x10c] ss:$16 sps:$4 sm:$0xff]  }
  0xb1   : > { %1283 = vmatprep.subr.bf16.mxu1 %v1838_v33  ;;  %v1923_v33 = vld [vmem:[#allocation5 + $0x108] ss:$16 sps:$4 sm:$0xff]  }
  0xb2   : > { %752 = vmatpush1.bf16.msra.mxu0 %v1794_v36  ;;  %v1839_v36 = vld [vmem:[#allocation5 + $0xc8] ss:$16 sps:$4 sm:$0xff]  }
  0xb3   : > { %753 = vmatprep.subr.bf16.mxu0 %v1802_v38  ;;  %v1847_v38 = vld [vmem:[#allocation5 + $0xac] ss:$16 sps:$4 sm:$0xff]  }
  0xb4   : > { %1284 = vmatpush1.bf16.msra.mxu1 %v1836_v35 }
  0xb5   : > { %1285 = vmatprep.subr.bf16.mxu1 %v1844_v37 }
  0xb6   : > { %754 = vmatpush1.bf16.msra.mxu0 %v1800_v40  ;;  %v1845_v40 = vld [vmem:[#allocation5 + $0xa8] ss:$16 sps:$4 sm:$0xff]  }
  0xb7   : > { %755 = vmatprep.subr.bf16.mxu0 %v1808_v41  ;;  %v1850_v41 = vld [vmem:[#allocation5 + $0x84] ss:$16 sps:$4 sm:$0xff]  }
  0xb8   : > { %1286 = vmatpush1.bf16.msra.mxu1 %v1842_v39 }
  0xb9   : > { %1287 = vmatprep.subr.bf16.mxu1 %v1850_v41 }
  0xba   : > { %756 = vmatpush1.bf16.msra.mxu0 %v1806_v42  ;;  %v1853_v42 = vld [vmem:[#allocation5 + $0x8c] ss:$16 sps:$4 sm:$0xff]  }
  0xbb   : > { %757 = vmatprep.subr.bf16.mxu0 %v1814_v43  ;;  %v1848_v43 = vld [vmem:[#allocation5 + $0x80] ss:$16 sps:$4 sm:$0xff]  }
  0xbc   : > { %1288 = vmatpush1.bf16.msra.mxu1 %v1848_v43 }
  0xbe   : > { %758 = vmatpush1.bf16.msra.mxu0 %v1812_v44  ;;  %v1851_v44 = vld [vmem:[#allocation5 + $0x88] ss:$16 sps:$4 sm:$0xff]  }
  0xbf   : > { %759 = vmatprep.subr.bf16.mxu0 %v1820_v45  ;;  %v1856_v45 = vld [vmem:[#allocation5 + $0x64] ss:$16 sps:$4 sm:$0xff]  }
  0xc0   : > { %1289 = vmatprep.subr.bf16.mxu1 %v1856_v45 }
  0xc2   : > { %760 = vmatpush1.bf16.msra.mxu0 %v1818_v46  ;;  %v1859_v46 = vld [vmem:[#allocation5 + $0x6c] ss:$16 sps:$4 sm:$0xff]  }
  0xc3   : > { %761 = vmatprep.subr.bf16.mxu0 %v1826_v47  ;;  %v1854_v47 = vld [vmem:[#allocation5 + $0x60] ss:$16 sps:$4 sm:$0xff]  }
  0xc4   : > { %1290 = vmatpush1.bf16.msra.mxu1 %v1854_v47 }
  0xc6   : > { %762 = vmatpush1.bf16.msra.mxu0 %v1824_v48  ;;  %v1857_v48 = vld [vmem:[#allocation5 + $0x68] ss:$16 sps:$4 sm:$0xff]  }
  0xc7   : > { %763 = vmatprep.subr.bf16.mxu0 %v1829_v49  ;;  %v1862_v49 = vld [vmem:[#allocation5 + $0x44] ss:$16 sps:$4 sm:$0xff]  }
  0xc8   : > { %1291 = vmatprep.subr.bf16.mxu1 %v1862_v49 }
  0xca   : > { %764 = vmatpush1.bf16.msra.mxu0 %v1827_v50  ;;  %v1865_v50 = vld [vmem:[#allocation5 + $0x4c] ss:$16 sps:$4 sm:$0xff]  }
  0xcb   : > { %1322 = vmatprep.subr.bf16.mxu0 %v1835_v30  ;;  %v1922_v30 = vld [vmem:[#allocation5 + $0x104] ss:$16 sps:$4 sm:$0xff]  }
  0xcd   : > { %782 = vmatmul.mubr.bf16.vlgmr.msra.gmra.mxu0 %v651_v53  ;;  %v1860_v53 = vld [vmem:[#allocation5 + $0x40] ss:$16 sps:$4 sm:$0xff]  }
  0xce   : > { %789 = vmatprep.mubr.bf16.mxu0 %v2171_v0  ;;  %v799_v0 = vsub.s32 0, %v798_v2  ;;  %1323 = vmatpush1.bf16.msra.mxu0 %v1833_v32  ;;  %v1875_v2 = vld [vmem:[#allocation5 + $0x8] ss:$16 sps:$4 sm:$0xff]   ;;  %v1920_v32 = vld [vmem:[#allocation5 + $0x100] ss:$16 sps:$4 sm:$0xff]  }
  0xcf   : > { %1324 = vmatprep.subr.bf16.mxu0 %v1841_v34  ;;  %1292 = vmatpush1.bf16.msra.mxu1 %v1860_v53 }
  0xd2   : > { %1325 = vmatpush1.bf16.msra.mxu0 %v1839_v36 }
  0xd3   : > { %1326 = vmatprep.subr.bf16.mxu0 %v1847_v38 }
  0xd5   : > { %790 = vmatmul.mubr.bf16.gmra.mxu0 %v652_v55  ;;  %v1863_v55 = vld [vmem:[#allocation5 + $0x48] ss:$16 sps:$4 sm:$0xff]  }
  0xd6   : > { %1327 = vmatpush1.bf16.msra.mxu0 %v1845_v40 }
  0xd7   : > { %1328 = vmatprep.subr.bf16.mxu0 %v1853_v42 }
  0xda   : > { %1329 = vmatpush1.bf16.msra.mxu0 %v1851_v44 }
  0xdb   : > { %1330 = vmatprep.subr.bf16.mxu0 %v1859_v46 }
  0xde   : > { %1331 = vmatpush1.bf16.msra.mxu0 %v1857_v48 }
  0xdf   : > { %1332 = vmatprep.subr.bf16.mxu0 %v1865_v50 }
  0xe2   : > { %1333 = vmatpush1.bf16.msra.mxu0 %v1863_v55 }
 0x16d   : > { %v2421_v56 = vpop.f32.mrf.mxu0 }
 0x16f   : > { %v2423_v57 = vpop.f32.mrf.mxu0  ;;  %v644_v60 = vpop.f32.mrf.mxu1 }
 0x170   : > { %v800_v3 = vrot.slane %v644_v60, %v799_v0  ;;  %v1866_v60 = vld [vmem:[#allocation5 + $0x20] ss:$16 sps:$4 sm:$0xff]  }
 0x171   : > { %v607_v58 = vpop.f32.mrf.mxu0  ;;  %v646_v61 = vpop.f32.mrf.mxu1 }
 0x172   : > { %v814_v14 = vrot.slane %v646_v61, %v799_v0  ;;  %v1868_v58 = vld [vmem:[#allocation5 + $0x24] ss:$16 sps:$4 sm:$0xff]   ;;  %v1869_v61 = vld [vmem:[#allocation5 + $0x28] ss:$16 sps:$4 sm:$0xff]  }
 0x173   : > { %v608_v59 = vpop.f32.mrf.mxu0  ;;  %v648_v62 = vpop.f32.mrf.mxu1  ;;  %1293 = vmatprep.subr.bf16.mxu1 %v1868_v58  ;;  %v1880_v0 = vld [vmem:[#allocation5 + $0x1e4] ss:$16 sps:$4 sm:$0xff]  }
 0x174   : > { %v1871_v59 = vld [vmem:[#allocation5 + $0x2c] ss:$16 sps:$4 sm:$0xff]   ;;  %1294 = vmatpush1.bf16.msra.mxu1 %v1866_v60  ;;  %v1874_v62 = vld [vmem:[#allocation5 + $0x4] ss:$16 sps:$4 sm:$0xff]  }
 0x175   : > { %v649_v63 = vpop.f32.mrf.mxu1  ;;  %1334 = vmatprep.subr.bf16.mxu0 %v1871_v59  ;;  %1295 = vmatprep.subr.bf16.mxu1 %v1874_v62 }
 0x176   : > { %1335 = vmatpush1.bf16.msra.mxu0 %v1869_v61  ;;  %v1877_v63 = vld [vmem:[#allocation5 + $0xc] ss:$16 sps:$4 sm:$0xff]  }
 0x177   : > { %1336 = vmatprep.subr.bf16.mxu0 %v1877_v63 }
 0x178   : > { %1296 = vmatpush1.bf16.msra.mxu1 %v1872_v1 }
 0x179   : > { %1297 = vmatprep.subr.bf16.mxu1 %v1880_v0 }
 0x17a   : > { %1337 = vmatpush1.bf16.msra.mxu0 %v1875_v2 }
 0x18d   : > { %v783_v5 = vpop.f32.mrf.mxu0 }
 0x18e   : > { %v801_v6 = vadd.f32 %v800_v3, %v783_v5  ;;  %v1881_v5 = vld [vmem:[#allocation5 + $0x1e8] ss:$16 sps:$4 sm:$0xff]  }
 0x18f   : > { %v785_v7 = vpop.f32.mrf.mxu0 }
 0x190   : > { %v807_v8 = vadd.f32 %v1597_v4, %v801_v6  ;;  %v1886_v6 = vld [vmem:[#allocation5 + $0x1c4] ss:$16 sps:$4 sm:$0xff]   ;;  %v1889_v7 = vld [vmem:[#allocation5 + $0x1cc] ss:$16 sps:$4 sm:$0xff]  }
 0x191   : > { %v786_v9 = vpop.f32.mrf.mxu0 }
 0x192   : > { %1926 = vtanh.f32 %v807_v8  ;;  %v802_v10 = vadd.f32 %v800_v3, %v786_v9  ;;  %v1883_v3 = vld [vmem:[#allocation5 + $0x1ec] ss:$16 sps:$4 sm:$0xff]   ;;  %v1884_v8 = vld [vmem:[#allocation5 + $0x1c0] ss:$16 sps:$4 sm:$0xff]   ;;  %v1887_v9 = vld [vmem:[#allocation5 + $0x1c8] ss:$16 sps:$4 sm:$0xff]  }
 0x193   : > { %v788_v11 = vpop.f32.mrf.mxu0  ;;  %1338 = vmatprep.subr.bf16.mxu0 %v1883_v3 }
 0x194   : > { %v808_v12 = vadd.f32 %v1597_v4, %v802_v10  ;;  %v1878_v4 = vld [vmem:[#allocation5 + $0x1e0] ss:$16 sps:$4 sm:$0xff]   ;;  %1339 = vmatpush2.bf16.msra.mxu0 %v1881_v5  ;;  %v1892_v10 = vld [vmem:[#allocation5 + $0x1a4] ss:$16 sps:$4 sm:$0xff]   ;;  %v1895_v11 = vld [vmem:[#allocation5 + $0x1ac] ss:$16 sps:$4 sm:$0xff]  }
 0x195   : > { %v791_v13 = vpop.f32.mrf.mxu0  ;;  %1298 = vmatpush2.bf16.msra.mxu1 %v1878_v4  ;;  %1340 = vmatprep.subr.bf16.mxu0 %v1889_v7 }
 0x196   : > { %1928 = vtanh.f32 %v808_v12  ;;  %1299 = vmatprep.subr.bf16.mxu1 %v1886_v6  ;;  %v1890_v12 = vld [vmem:[#allocation5 + $0x1a0] ss:$16 sps:$4 sm:$0xff]   ;;  %v1893_v13 = vld [vmem:[#allocation5 + $0x1a8] ss:$16 sps:$4 sm:$0xff]  }
 0x197   : > { %v792_v16 = vpop.f32.mrf.mxu0 }
 0x198   : > { %v815_v17 = vadd.f32 %v814_v14, %v792_v16  ;;  %1341 = vmatpush2.bf16.msra.mxu0 %v1887_v9  ;;  %v1898_v14 = vld [vmem:[#allocation5 + $0x184] ss:$16 sps:$4 sm:$0xff]   ;;  %v1896_v16 = vld [vmem:[#allocation5 + $0x180] ss:$16 sps:$4 sm:$0xff]  }
 0x199   : > { %v794_v18 = vpop.f32.mrf.mxu0  ;;  %1300 = vmatpush2.bf16.msra.mxu1 %v1884_v8  ;;  %1342 = vmatprep.subr.bf16.mxu0 %v1895_v11 }
 0x19a   : > { %v820_v19 = vadd.f32 %v1598_v15, %v815_v17  ;;  %1301 = vmatprep.subr.bf16.mxu1 %v1892_v10  ;;  %v1901_v15 = vld [vmem:[#allocation5 + $0x18c] ss:$16 sps:$4 sm:$0xff]   ;;  %v1899_v17 = vld [vmem:[#allocation5 + $0x188] ss:$16 sps:$4 sm:$0xff]   ;;  %v1904_v18 = vld [vmem:[#allocation5 + $0x164] ss:$16 sps:$4 sm:$0xff]  }
 0x19b   : > { %v795_v20 = vpop.f32.mrf.mxu0 }
 0x19c   : > { %1930 = vtanh.f32 %v820_v19  ;;  %1343 = vmatpush2.bf16.msra.mxu0 %v1893_v13  ;;  %v1907_v19 = vld [vmem:[#allocation5 + $0x16c] ss:$16 sps:$4 sm:$0xff]   ;;  %v1902_v20 = vld [vmem:[#allocation5 + $0x160] ss:$16 sps:$4 sm:$0xff]  }
 0x19d   : > { %1302 = vmatpush2.bf16.msra.mxu1 %v1890_v12  ;;  %1344 = vmatprep.subr.bf16.mxu0 %v1901_v15 }
 0x19e   : > { %1303 = vmatprep.subr.bf16.mxu1 %v1898_v14 }
 0x19f   : > { %v1927_v22 = vpop.eup %1926 }
 0x1a0   : > { %v826_v23 = vmul.f32 %v1927_v22, %v1599_v21  ;;  %1345 = vmatpush2.bf16.msra.mxu0 %v1899_v17  ;;  %v1910_v22 = vld [vmem:[#allocation5 + $0x144] ss:$16 sps:$4 sm:$0xff]  }
 0x1a1   : > { %1304 = vmatpush2.bf16.msra.mxu1 %v1896_v16  ;;  %1346 = vmatprep.subr.bf16.mxu0 %v1907_v19 }
 0x1a2   : > { %828 = vadd.xlane.f32.xlu0 %v826_v23  ;;  %1305 = vmatprep.subr.bf16.mxu1 %v1904_v18  ;;  %v1913_v23 = vld [vmem:[#allocation5 + $0x14c] ss:$16 sps:$4 sm:$0xff]  }
 0x1a3   : > { %v1929_v24 = vpop.eup %1928 }
 0x1a4   : > { %v827_v25 = vmul.f32 %v1929_v24, %v1599_v21  ;;  %v1905_v21 = vld [vmem:[#allocation5 + $0x168] ss:$16 sps:$4 sm:$0xff]   ;;  %v1908_v24 = vld [vmem:[#allocation5 + $0x140] ss:$16 sps:$4 sm:$0xff]  }
 0x1a5   : > { %1306 = vmatpush2.bf16.msra.mxu1 %v1902_v20  ;;  %1347 = vmatpush2.bf16.msra.mxu0 %v1905_v21 }
 0x1a6   : > { %830 = vadd.xlane.f32.xlu0 %v827_v25  ;;  %v1911_v25 = vld [vmem:[#allocation5 + $0x148] ss:$16 sps:$4 sm:$0xff]   ;;  %1307 = vmatprep.subr.bf16.mxu1 %v1910_v22 }
 0x1a7   : > { %1348 = vmatprep.subr.bf16.mxu0 %v1913_v23 }
 0x1a9   : > { %v1931_v27 = vpop.eup %1930  ;;  %1308 = vmatpush2.bf16.msra.mxu1 %v1908_v24  ;;  %1349 = vmatpush2.bf16.msra.mxu0 %v1911_v25 }
 0x1aa   : > { %v836_v28 = vmul.f32 %v1931_v27, %v1600_v26  ;;  %v1916_v26 = vld [vmem:[#allocation5 + $0x124] ss:$16 sps:$4 sm:$0xff]   ;;  %v1919_v27 = vld [vmem:[#allocation5 + $0x12c] ss:$16 sps:$4 sm:$0xff]  }
 0x1ab   : > { %1309 = vmatprep.subr.bf16.mxu1 %v1916_v26  ;;  %1350 = vmatprep.subr.bf16.mxu0 %v1919_v27 }
 0x1ac   : > { %837 = vadd.xlane.f32.xlu1 %v836_v28  ;;  %v1914_v28 = vld [vmem:[#allocation5 + $0x120] ss:$16 sps:$4 sm:$0xff]  }
 0x1ad   : > { %1310 = vmatpush2.bf16.msra.mxu1 %v1914_v28  ;;  %1351 = vmatpush2.bf16.msra.mxu0 %v1917_v29 }
 0x1ae   : > { %1311 = vmatprep.subr.bf16.mxu1 %v1922_v30  ;;  %1352 = vmatprep.subr.bf16.mxu0 %v1925_v31 }
 0x1b1   : > { %1312 = vmatpush2.bf16.msra.mxu1 %v1920_v32  ;;  %1353 = vmatpush2.bf16.msra.mxu0 %v1923_v33 }
 0x22b   : > { %v829_v34 = vpop.xlane.xlu0 %828 }
 0x22f   : > { %v831_v35 = vpop.xlane.xlu0 %830 }
 0x230   : > { %v839_v36 = vmax.f32 %v829_v34, %v831_v35 }
 0x232   : > { %v840_v37 = vrot.slane %v839_v36, 4 }
 0x234   : > { %v841_v38 = vmax.f32 %v839_v36, %v840_v37  ;;  %v375_v36 = vld [vmem:[#allocation7 + $0x9] sm:$0x1] }
 0x235   : > { %v838_v39 = vpop.xlane.xlu1 %837 }
 0x236   : > { %v842_v40 = vrot.slane %v841_v38, 2  ;;  %v862_v41 = vrot.slane %v838_v39, 4 }
 0x238   : > { %v843_v42 = vmax.f32 %v841_v38, %v842_v40  ;;  %v863_v43 = vmax.f32 %v838_v39, %v862_v41 }
 0x23a   : > { %v844_v44 = vrot.slane %v843_v42, 1  ;;  %v864_v45 = vrot.slane %v863_v43, 2 }
 0x23c   : > { %v845_v46 = vmax.f32 %v843_v42, %v844_v44  ;;  %v865_v47 = vmax.f32 %v863_v43, %v864_v45 }
 0x23e   : > { %v846_v48 = vsub.f32 %v829_v34, %v845_v46  ;;  %v847_v49 = vsub.f32 %v831_v35, %v845_v46  ;;  %v866_v50 = vrot.slane %v865_v47, 1 }
 0x240   : > { %v848_v53 = vmul.f32 1.442695, %v846_v48  ;;  %v850_v55 = vmul.f32 1.442695, %v847_v49  ;;  %v867_v58 = vmax.f32 %v865_v47, %v866_v50  ;;  %v368_v47 = vld [vmem:[#allocation7 + $0x2] sm:$0x1] }
 0x242   : > { %1932 = vpow2.f32 %v848_v53  ;;  %v868_v59 = vsub.f32 %v838_v39, %v867_v58 }
 0x243   : > { %1934 = vpow2.f32 %v850_v55 }
 0x244   : > { %v869_v60 = vmul.f32 1.442695, %v868_v59 }
 0x246   : > { %1936 = vpow2.f32 %v869_v60 }
 0x24f   : > { %v1933_v61 = vpop.eup %1932 }
 0x250   : > { %v1935_v62 = vpop.eup %1934 }
 0x251   : > { %v852_v63 = vadd.f32 %v1935_v62, %v1933_v61 }
 0x253   : > { %v1937_v1 = vpop.eup %1936  ;;  %v853_v2 = vrot.slane %v852_v63, 4 }
 0x254   : > { %v871_v0 = vrot.slane %v1937_v1, 4 }
 0x255   : > { %v854_v3 = vadd.f32 %v853_v2, %v852_v63  ;;  %v373_v2 = vld [vmem:[#allocation7 + $0x7] sm:$0x1] }
 0x256   : > { %v872_v4 = vadd.f32 %v1937_v1, %v871_v0 }
 0x257   : > { %v855_v5 = vrot.slane %v854_v3, 2 }
 0x258   : > { %v873_v6 = vrot.slane %v872_v4, 2 }
 0x259   : > { %v856_v7 = vadd.f32 %v855_v5, %v854_v3 }
 0x25a   : > { %v874_v8 = vadd.f32 %v873_v6, %v872_v4 }
 0x25b   : > { %v857_v9 = vrot.slane %v856_v7, 1 }
 0x25c   : > { %v875_v10 = vrot.slane %v874_v8, 1 }
 0x25d   : > { %v858_v11 = vadd.f32 %v857_v9, %v856_v7  ;;  %v371_v9 = vld [vmem:[#allocation7 + $0x5] sm:$0x1] }
 0x25e   : > { %v876_v12 = vadd.f32 %v875_v10, %v874_v8 }
 0x25f   : > { %1938 = vrcp.f32 %v858_v11 }
 0x260   : > { %1940 = vrcp.f32 %v876_v12 }
 0x26c   : > { %v1939_v13 = vpop.eup %1938 }
 0x26d   : > { %v1941_v14 = vpop.eup %1940  ;;  %v861_v15 = vmul.f32 %v1939_v13, %v1935_v62  ;;  %v860_v16 = vmul.f32 %v1939_v13, %v1933_v61 }
 0x26e   : > { %v878_v17 = vmul.f32 %v1941_v14, %v1937_v1  ;;  %v372_v1 = vld [vmem:[#allocation7 + $0x6] sm:$0x1] }
 0x26f   : > { %v879_v18 = vmul.f32 %v860_v16, %v2408_v51  ;;  %v880_v19 = vmul.f32 %v861_v15, %v2411_v52 }
 0x270   : > { %v888_v20 = vmul.f32 %v878_v17, %v2417_v54  ;;  %v374_v54 = vld [vmem:[#allocation7 + $0x8] sm:$0x1] }
 0x271   : > { %v881_v21 = vadd.f32 %v880_v19, %v879_v18 }
 0x272   : > { %v889_v22 = vrot.slane %v888_v20, 4 }
 0x273   : > { %v882_v23 = vrot.slane %v881_v21, 4 }
 0x274   : > { %v890_v24 = vadd.f32 %v889_v22, %v888_v20 }
 0x275   : > { %v883_v25 = vadd.f32 %v882_v23, %v881_v21 }
 0x276   : > { %v891_v26 = vrot.slane %v890_v24, 2 }
 0x277   : > { %v884_v27 = vrot.slane %v883_v25, 2 }
 0x278   : > { %v892_v28 = vadd.f32 %v891_v26, %v890_v24 }
 0x279   : > { %v885_v29 = vadd.f32 %v884_v27, %v883_v25 }
 0x27a   : > { %v893_v30 = vrot.slane %v892_v28, 1 }
 0x27b   : > { %v886_v31 = vrot.slane %v885_v29, 1 }
 0x27c   : > { %v894_v32 = vadd.f32 %v893_v30, %v892_v28 }
 0x27d   : > { %v887_v33 = vadd.f32 %v886_v31, %v885_v29 }
 0x27e   : > { %v896_v34 = vpack.c.bf16 %v894_v32, %v894_v32 }
 0x27f   : > { %v895_v35 = vpack.c.bf16 %v887_v33, %v887_v33 }
 0x280   : > { %1313 = vmatprep.mubr.bf16.mxu1 %v896_v34  ;;  %1354 = vmatprep.mubr.bf16.mxu0 %v896_v34 }
 0x281   : > { %1314 = vmatmul.mubr.bf16.vlgmr.msra.gmra.mxu1 %v895_v35  ;;  %1355 = vmatmul.mubr.bf16.vlgmr.msra.gmra.mxu0 %v895_v35 }
 0x341   : > { %v1315_v51 = vpop.f32.mrf.mxu1  ;;  %v1356_v52 = vpop.f32.mrf.mxu0 }
 0x342   : > { %v1363_v0 = vadd.f32 %v1315_v51, %v372_v1  ;;  %v1366_v4 = vadd.f32 %v1356_v52, %v373_v2 }
 0x343   : > { %v1317_v37 = vpop.f32.mrf.mxu1  ;;  %v1358_v38 = vpop.f32.mrf.mxu0 }
 0x344   : > { %v1364_v39 = vadd.f32 %v1317_v37, %v374_v54  ;;  %v1367_v40 = vadd.f32 %v1358_v38, %v375_v36 }
 0x345   : > { %v1319_v41 = vpop.f32.mrf.mxu1  ;;  %v1360_v42 = vpop.f32.mrf.mxu0 }
 0x346   : > { %v1365_v43 = vadd.f32 %v1364_v39, %v2423_v57  ;;  %v1368_v44 = vadd.f32 %v1367_v40, %v2423_v57 }
 0x347   : > { %v1320_v45 = vpop.f32.mrf.mxu1  ;;  %v1361_v46 = vpop.f32.mrf.mxu0 }
 0x348   : > { %1942 = vtanh.f32 %v1365_v43 }
 0x349   : > { %1944 = vtanh.f32 %v1368_v44 }
 0x355   : > { %v1943_v48 = vpop.eup %1942 }
 0x356   : > { %v1945_v49 = vpop.eup %1944  ;;  %v1370_v50 = vmul.f32 %v1943_v48, %v368_v47 }
 0x357   : > { %v1376_v53 = vmul.f32 %v1945_v49, %v368_v47 }
 0x358   : > { %v1372_v55 = vsel %vm1371_vm0, %v1370_v50, 0.0 }
 0x359   : > { %1373 = vadd.xlane.f32.xlu1 %v1372_v55  ;;  %v1377_v58 = vsel %vm1371_vm0, %v1376_v53, 0.0 }
 0x35a   : > { %1378 = vadd.xlane.f32.xlu0 %v1377_v58 }
 0x3e2   : > { %v1374_v59 = vpop.xlane.xlu1 %1373 }
 0x3e3   : > { %v1379_v60 = vpop.xlane.xlu0 %1378 }
 0x3e4   : > { %v1380_v61 = vsub.f32 %v1379_v60, %v1374_v59 }
 0x3e6   : > { %v1381_v62 = vmul.f32 1.442695, %v1380_v61 }
 0x3e8   : > { %1946 = vpow2.f32 %v1381_v62 }
 0x3f5   : > { %v1947_v57 = vpop.eup %1946 }
 0x3f6   : > { %v1383_v63 = vadd.f32 1.0, %v1947_v57 }
 0x3f8   : > { %1948 = vrcp.f32 %v1383_v63 }
 0x405   : > { %v1949_v3 = vpop.eup %1948 }
 0x406   : > { %v1385_v5 = vsub.f32 1.0, %v1949_v3  ;;  %v1386_v6 = vmul.f32 %v1949_v3, %v1363_v0 }
 0x408   : > { %v1387_v7 = vadd.f32 %v1386_v6, %v2421_v56  ;;  %v1388_v8 = vmul.f32 %v1385_v5, %v1366_v4 }
 0x40a   : > { %v1389_v10 = vadd.f32 %v1388_v8, %v1387_v7 }
 0x40c   : > { %v1390_v11 = vadd.f32 %v1389_v10, %v371_v9 }
 0x40e   : > { %1950 = vtanh.f32 %v1390_v11 }
 0x41b   : > { %v1951_v12 = vpop.eup %1950 }
 0x41c   : > { %1392 = vst [vmem:[%s357_s30] sm:$0x1] %v1951_v12 }
 0x41d   : > { %2099 = shalt.err (!%p2096_p7)
}
 0x41e   : > { %s2100_s29 = scalar_lea.hbm %s2436_s0, 16  ;;  %s2104_s13 = scalar_lea.hbm %s2478_s6, 64 }
 0x41f   : > { %p2101_p10 = scmp.ne.s32.totalorder %s2436_s0, %s2100_s29  ;;  %p2105_p13 = scmp.lt.s32.totalorder %s2436_s0, %s2478_s6 }
 0x420   : > { %p2106_p2 = scmp.lt.s32.totalorder %s2104_s13, %s2100_s29 }
 0x421   : > { %p2102_p12 = pnand %p2101_p10, %p2513_p4 }
 0x422   : > { %p2107_p3 = por %p2106_p2, %p2105_p13 }
 0x423   : > { %p2103_p9 = pneg %p2102_p12 }
 0x425   : > { %p2108_p1 = pnand %p2107_p3, %p2103_p9 }
 0x427   : > { %2111 = shalt.err (!%p2108_p1)
}
 0x428   : > { %1685 = dma.vmem_to_hbm [thread:$0]  (%p2513_p4), %s1407_s8, 16, %s2436_s0, %s1394_s1  }
 0x429 PF: > { %p1715_p6 = scmp.ge.s32.totalorder %s2158_s24, 2  ;;  %s1418_s16 = sand.u32 1, %s2146_s21  }
 0x42a   : > { %p2514_p8 = scmp.ne.s32.totalorder %s2493_s28, 0  ;;  %s1419_s10 = scalar_lea.sflag [#allocation4], %s1418_s16 }
 0x42c   : > { %p1705_p11 = pnand %p1715_p6, %p2514_p8 }
 0x42e   : > { %p1706_p5 = pneg %p1705_p11 }
 0x430   : > { %2141 = dma.done.wait (%p1706_p5), %s1419_s10, 16  }
 0x431   : > { %2143 = vsyncadd (%p1706_p5), %s1419_s10, 4294967280  ;;  %s2515_s11 = sld [smem:[#allocation16_spill]]  ;;  %p21_p0 = scmp.ge.s32.totalorder %s2261_s9, 6  }
 0x432   : > { %s2516_s23 = sld [smem:[#allocation17_spill]]  ;;  %s2517_s21 = smov %s2150_s22 }
 0x433   : > { %s2519_s24 = smov %s2261_s9  ;;  %23 = sbr.rel (!%p21_p0) target bundleno = 11 (0xb), region = 116 }
 0x437   : > { %s2518_s22 = smov %s2515_s11 }
 0x438   :  { %1423 = vsyncpa [#allocation3], 1 }
 0x439   :  { %1425 = vsyncpa [#allocation3 + $0x1], 1 }
 0x43a   :  { %1426 = vsyncpa [#allocation6], 1 }
 0x43b   :  { %1427 = vsyncpa [#allocation9], 1 }
 0x43c   :  { %1429 = vsyncpa [#allocation9 + $0x1], 1 }
 0x43d   :  { %1430 = vsyncpa [#allocation4], 1 }
 0x43e   :  { %1432 = vsyncpa [#allocation4 + $0x1], 1 }

</bundles_post_ra>
